<compile_context>
chip_gen: v7x
topology: tpu7x:2x2x1
jax: 0.10.0
libtpu: 0.0.40
codegen_flags: <defaults>
</compile_context>

<pallas_src>
import math

import jax
import jax.numpy as jnp
from jax.experimental import pallas as pl
from jax.experimental.pallas import tpu as pltpu


# ----------------------------- Pallas kernel --------------------------------

def _channel_attention_kernel(x_ref, w1t_ref, w2t_ref, o_ref):
    # x block: (TB, C, HW); w1t: (C, hidden); w2t: (hidden, C); out: (TB, C)
    x = x_ref[...]                                    # streamed slab (f32)
    avg = jnp.mean(x, axis=-1)                        # (TB, C)  adaptive avg pool
    mx = jnp.max(x, axis=-1)                          # (TB, C)  adaptive max pool

    w1t = w1t_ref[...]                                # (C, hidden)
    w2t = w2t_ref[...]                                # (hidden, C)

    def mlp(p):                                       # fc2(relu(fc1(p)))
        h = jnp.maximum(
            jnp.dot(p, w1t, preferred_element_type=jnp.float32), 0.0)
        return jnp.dot(h, w2t, preferred_element_type=jnp.float32)

    gate = jax.nn.sigmoid(mlp(avg) + mlp(mx))         # (TB, C)
    o_ref[...] = gate.astype(o_ref.dtype)


def channel_attention_forward(x: jnp.ndarray,
                              fc1_w: jnp.ndarray,
                              fc2_w: jnp.ndarray,
                              *,
                              block_bytes: int = 2 * 1024 * 1024) -> jnp.ndarray:
    """x: (B, C, H, W); fc1_w: (hidden, C, 1, 1); fc2_w: (C, hidden, 1, 1).
    Returns sigmoid channel gate of shape (B, C, 1, 1)."""
    B, C, H, W = x.shape
    hidden = fc1_w.shape[0]
    assert fc1_w.shape == (hidden, C, 1, 1)
    assert fc2_w.shape == (C, hidden, 1, 1)

    HW = H * W
    x2 = x.reshape(B, C, HW)                          # lane-dense last dim
    w1t = fc1_w.reshape(hidden, C).T                  # (C, hidden)
    w2t = fc2_w.reshape(C, hidden).T                  # (hidden, C)

    # Batch tile size: target ~block_bytes per streamed slab, sublane-aligned.
    bytes_per_batch = C * HW * x2.dtype.itemsize
    tb = max(1, min(B, block_bytes // max(1, bytes_per_batch)))
    if tb < B:
        tb = max(8, (tb // 8) * 8)                    # keep (TB, C) output block aligned
    grid_b = pl.cdiv(B, tb)

    out = pl.pallas_call(
        _channel_attention_kernel,
        out_shape=jax.ShapeDtypeStruct((B, C), x.dtype),
        grid_spec=pltpu.PrefetchScalarGridSpec(
            num_scalar_prefetch=0,
            grid=(grid_b,),
            in_specs=[
                pl.BlockSpec((tb, C, HW), lambda b: (b, 0, 0)),   # streamed x slab
                pl.BlockSpec((C, hidden), lambda b: (0, 0)),      # resident fc1 weight
                pl.BlockSpec((hidden, C), lambda b: (0, 0)),      # resident fc2 weight
            ],
            out_specs=pl.BlockSpec((tb, C), lambda b: (b, 0)),
        ),
        compiler_params=pltpu.CompilerParams(
            dimension_semantics=("parallel",),
        ),
    )(x2, w1t, w2t)

    return out.reshape(B, C, 1, 1)


# ----------------------------- JAX reference ---------------------------------

def channel_attention_ref(x, fc1_w, fc2_w):
    B, C, H, W = x.shape
    hidden = fc1_w.shape[0]
    w1 = fc1_w.reshape(hidden, C)
    w2 = fc2_w.reshape(C, hidden)
    avg = x.mean(axis=(2, 3))                         # (B, C)
    mx = x.max(axis=(2, 3))                           # (B, C)

    def mlp(p):
        return jnp.maximum(p @ w1.T, 0.0) @ w2.T

    out = jax.nn.sigmoid(mlp(avg) + mlp(mx))
    return out.reshape(B, C, 1, 1)


# --------------------------------- main ---------------------------------------

if __name__ == "__main__":
    # in_planes must be divisible by 16 (the module hard-codes // 16).
    B, C, H, W = 2, 64, 16, 16
    hidden = C // 16

    key = jax.random.PRNGKey(0)
    kx, k1, k2 = jax.random.split(key, 3)
    x = jax.random.normal(kx, (B, C, H, W), dtype=jnp.float32)
    fc1_w = jax.random.normal(k1, (hidden, C, 1, 1), dtype=jnp.float32) / math.sqrt(C)
    fc2_w = jax.random.normal(k2, (C, hidden, 1, 1), dtype=jnp.float32) / math.sqrt(hidden)

    out = channel_attention_forward(x, fc1_w, fc2_w)
    out = jax.block_until_ready(out)

    ref = channel_attention_ref(x, fc1_w, fc2_w)
    assert out.shape == (B, C, 1, 1)
    assert jnp.allclose(out, ref, atol=1e-5, rtol=1e-5), "mismatch vs reference"

    print("KERNEL_OK")
</pallas_src>

<mosaic_0001>
module attributes {stable_mosaic.version = 11 : i64} {
  func.func @_channel_attention_kernel(%arg0: i32, %arg1: memref<2x64x256xf32, #tpu.memory_space<vmem>>, %arg2: memref<64x4xf32, #tpu.memory_space<vmem>>, %arg3: memref<4x64xf32, #tpu.memory_space<vmem>>, %arg4: memref<2x64xf32, #tpu.memory_space<vmem>>) attributes {dimension_semantics = [#tpu.dimension_semantics<parallel>], iteration_bounds = array<i64: 1>, scalar_prefetch = 0 : i64, scratch_operands = 0 : i64, tpu.core_type = #tpu.core_type<tc>, window_params = [{transform_indices = @transform_0, window_bounds = array<i64: 2, 64, 256>}, {pipeline_mode = #tpu.pipeline_mode<synchronous>, transform_indices = @transform_1, window_bounds = array<i64: 64, 4>}, {pipeline_mode = #tpu.pipeline_mode<synchronous>, transform_indices = @transform_2, window_bounds = array<i64: 4, 64>}, {transform_indices = @transform_3, window_bounds = array<i64: 2, 64>}]} {
    %c0 = arith.constant 0 : index
    %c0_0 = arith.constant 0 : index
    %c0_1 = arith.constant 0 : index
    %0 = vector.load %arg1[%c0, %c0_0, %c0_1] : memref<2x64x256xf32, #tpu.memory_space<vmem>>, vector<2x64x256xf32>
    %cst = arith.constant dense<0.000000e+00> : vector<2x64xf32>
    %1 = vector.multi_reduction <add>, %0, %cst [2] : vector<2x64x256xf32> to vector<2x64xf32>
    %cst_2 = arith.constant 2.560000e+02 : f32
    %2 = vector.broadcast %cst_2 : f32 to vector<2x64xf32>
    %3 = arith.divf %1, %2 : vector<2x64xf32>
    %cst_3 = arith.constant dense<0xFF800000> : vector<2x64xf32>
    %4 = vector.multi_reduction <maximumf>, %0, %cst_3 [2] : vector<2x64x256xf32> to vector<2x64xf32>
    %c0_4 = arith.constant 0 : index
    %c0_5 = arith.constant 0 : index
    %5 = vector.load %arg2[%c0_4, %c0_5] : memref<64x4xf32, #tpu.memory_space<vmem>>, vector<64x4xf32>
    %c0_6 = arith.constant 0 : index
    %c0_7 = arith.constant 0 : index
    %6 = vector.load %arg3[%c0_6, %c0_7] : memref<4x64xf32, #tpu.memory_space<vmem>>, vector<4x64xf32>
    %cst_8 = arith.constant dense<0.000000e+00> : vector<2x4xf32>
    %7 = tpu.matmul %3, %5, %cst_8 {dimension_numbers = #tpu.dot_dimension_numbers<[1], [0], [0], [1], [0, 0, 1, 1], [], []>} : vector<2x64xf32>, vector<64x4xf32>, vector<2x4xf32> -> vector<2x4xf32>
    %cst_9 = arith.constant 0.000000e+00 : f32
    %8 = vector.broadcast %cst_9 : f32 to vector<2x4xf32>
    %9 = arith.maximumf %7, %8 : vector<2x4xf32>
    %cst_10 = arith.constant dense<0.000000e+00> : vector<2x64xf32>
    %10 = tpu.matmul %9, %6, %cst_10 {dimension_numbers = #tpu.dot_dimension_numbers<[1], [0], [0], [1], [0, 0, 1, 1], [], []>} : vector<2x4xf32>, vector<4x64xf32>, vector<2x64xf32> -> vector<2x64xf32>
    %cst_11 = arith.constant dense<0.000000e+00> : vector<2x4xf32>
    %11 = tpu.matmul %4, %5, %cst_11 {dimension_numbers = #tpu.dot_dimension_numbers<[1], [0], [0], [1], [0, 0, 1, 1], [], []>} : vector<2x64xf32>, vector<64x4xf32>, vector<2x4xf32> -> vector<2x4xf32>
    %cst_12 = arith.constant 0.000000e+00 : f32
    %12 = vector.broadcast %cst_12 : f32 to vector<2x4xf32>
    %13 = arith.maximumf %11, %12 : vector<2x4xf32>
    %cst_13 = arith.constant dense<0.000000e+00> : vector<2x64xf32>
    %14 = tpu.matmul %13, %6, %cst_13 {dimension_numbers = #tpu.dot_dimension_numbers<[1], [0], [0], [1], [0, 0, 1, 1], [], []>} : vector<2x4xf32>, vector<4x64xf32>, vector<2x64xf32> -> vector<2x64xf32>
    %15 = arith.addf %10, %14 : vector<2x64xf32>
    %16 = arith.negf %15 : vector<2x64xf32>
    %17 = math.exp %16 : vector<2x64xf32>
    %cst_14 = arith.constant 1.000000e+00 : f32
    %18 = vector.broadcast %cst_14 : f32 to vector<2x64xf32>
    %19 = arith.addf %18, %17 : vector<2x64xf32>
    %20 = arith.divf %18, %19 : vector<2x64xf32>
    %c0_15 = arith.constant 0 : index
    %c0_16 = arith.constant 0 : index
    %21 = vector.load %arg4[%c0_15, %c0_16] : memref<2x64xf32, #tpu.memory_space<vmem>>, vector<2x64xf32>
    tpu.vector_store %arg4[%c0_15, %c0_16], %20 {strides = array<i32>} : memref<2x64xf32, #tpu.memory_space<vmem>>, vector<2x64xf32>,
    return
  }
  func.func @transform_0(%arg0: i32) -> (i32, i32, i32) {
    %c0_i32 = arith.constant 0 : i32
    %c0_i32_0 = arith.constant 0 : i32
    %c0_i32_1 = arith.constant 0 : i32
    return %arg0, %c0_i32, %c0_i32_0 : i32, i32, i32
  }
  func.func @transform_1(%arg0: i32) -> (i32, i32) {
    %c0_i32 = arith.constant 0 : i32
    %c0_i32_0 = arith.constant 0 : i32
    %c0_i32_1 = arith.constant 0 : i32
    return %c0_i32, %c0_i32_0 : i32, i32
  }
  func.func @transform_2(%arg0: i32) -> (i32, i32) {
    %c0_i32 = arith.constant 0 : i32
    %c0_i32_0 = arith.constant 0 : i32
    %c0_i32_1 = arith.constant 0 : i32
    return %c0_i32, %c0_i32_0 : i32, i32
  }
  func.func @transform_3(%arg0: i32) -> (i32, i32) {
    %c0_i32 = arith.constant 0 : i32
    %c0_i32_0 = arith.constant 0 : i32
    return %arg0, %c0_i32 : i32, i32
  }
}

</mosaic_0001>

<bundles_post_ra>
// kernel: tpu_custom_call.1
= control target key start
LH: loop header
LB: loop body
LE: loop exit
PB: predicated region body
PF: predicated region fallthrough
CT: control target
= control target key end

     0   :  { %8 = vsyncpa [#allocation3], 0  ;;  %s1070_s0 = inlined_call_operand.hbm [shape: f32[2,64,256], index: 0, kind: input, shape index: {}]   ;;  %s1071_s1 = inlined_call_operand.vmem [shape: f32[64,4], index: 1, kind: input, shape index: {}]   ;;  %s1072_s2 = inlined_call_operand.vmem [shape: f32[4,64], index: 2, kind: input, shape index: {}]   ;;  %s1073_s3 = inlined_call_operand.hbm [shape: f32[2,64], index: 3, kind: output, shape index: {}]  }
   0x1   :  { %9 = vsyncpa [#allocation4], 0  ;;  %s872_s12 = smov [#allocation2]   ;;  %s824_s16 = scalar_lea.hbm %s1070_s0, 4096 }
   0x2   :  { %s15_s13 = sshll.u32 %s872_s12, 4  ;;  %p825_p0 = scmp.ne.s32.totalorder %s1070_s0, %s824_s16  ;;  %s16_s13 = int_to_ptr.vmem [resolvable:$true] %s15_s13 }
   0x3   :  { %p828_p1 = scmp.lt.u32.totalorder %s824_s16, %s1070_s0 }
   0x5   :  { %p830_p2 = pnand %p828_p1, %p825_p0 }
   0x7   :  { %833 = shalt.err (!%p830_p2)
}
   0x8   :  { %s834_s21 = scalar_lea.vmem %s16_s13, 4096  ;;  %p839_p4 = scmp.lt.s32.totalorder %s16_s13, %s16_s13 }
   0x9   :  { %p835_p3 = scmp.ne.s32.totalorder %s16_s13, %s834_s21  ;;  %p840_p5 = scmp.lt.s32.totalorder %s834_s21, %s834_s21 }
   0xb   :  { %p841_p6 = por %p840_p5, %p839_p4 }
   0xd   :  { %p842_p7 = pnand %p841_p6, %p835_p3 }
   0xf   :  { %845 = shalt.err (!%p842_p7)
}
  0x10   :  { %s873_s22 = smov 256   ;;  %s874_s23 = smov 16  }
  0x11   :  { %21 = dma.hbm_to_vmem [thread:$0]  %s1070_s0, 4096, %s16_s13, [#allocation3], %s873_s22, %s873_s22, %s874_s23  }
  0x12   :  { %868 = dma.done.wait [#allocation3], 4096  }
  0x13   :  { %869 = vsyncadd [#allocation3], 4294963200  ;;  %v45_v0 = vld [vmem:[#allocation2 + $0x80] sm:$0xff]  ;;  %v46_v1 = vld [vmem:[#allocation2 + $0x88] sm:$0xff]  ;;  %vm876_vm0 = vmmov 0   ;;  %vm210_vm1 = vcmask 130112  }
  0x14   :  { %v29_v2 = vld [vmem:[#allocation2] sm:$0xff]  ;;  %v85_v3 = vadd.f32 %v46_v1, %v45_v0  ;;  %v30_v4 = vld [vmem:[#allocation2 + $0x8] sm:$0xff]  ;;  %v47_v5 = vld [vmem:[#allocation2 + $0x90] sm:$0xff]  ;;  %v150_v27 = vmax.f32 %v45_v0, %v46_v1  ;;  %v875_v1 = vmov 0.0|0.0   ;;  %vm217_vm2 = vcmask 195712  }
  0x15   :  { %v48_v6 = vld [vmem:[#allocation2 + $0x98] sm:$0xff]  ;;  %v61_v7 = vadd.f32 %v30_v4, %v29_v2  ;;  %v31_v8 = vld [vmem:[#allocation2 + $0x10] sm:$0xff]  ;;  %v49_v12 = vld [vmem:[#allocation2 + $0xa0] sm:$0xff]  ;;  %v126_v25 = vmax.f32 %v29_v2, %v30_v4  ;;  %788 = vmatprep.subr.bf16.mxu0 %v875_v1  ;;  %800 = vmatprep.subr.bf16.mxu1 %v875_v1  ;;  %vm224_vm3 = vcmask 261312   ;;  %vm231_vm4 = vcmask 326912  }
  0x16   :  { %v32_v9 = vld [vmem:[#allocation2 + $0x18] sm:$0xff]  ;;  %86 = vadd.xlane.f32.xlu1 %v85_v3  ;;  %v88_v10 = vadd.f32 %v48_v6, %v47_v5  ;;  %v50_v13 = vld [vmem:[#allocation2 + $0xa8] sm:$0xff]  ;;  %v33_v14 = vld [vmem:[#allocation2 + $0x20] sm:$0xff]  ;;  %v153_v26 = vmax.f32 %v47_v5, %v48_v6  ;;  %vm238_vm5 = vcmask 392512   ;;  %vm245_vm6 = vcmask 458112  }
  0x17   :  { %62 = vadd.xlane.f32.xlu0 %v61_v7  ;;  %v64_v11 = vadd.f32 %v32_v9, %v31_v8  ;;  %v34_v15 = vld [vmem:[#allocation2 + $0x28] sm:$0xff]  ;;  %v91_v16 = vadd.f32 %v50_v13, %v49_v12  ;;  %v51_v18 = vld [vmem:[#allocation2 + $0xb0] sm:$0xff]  ;;  %v52_v19 = vld [vmem:[#allocation2 + $0xb8] sm:$0xff]  ;;  %v129_v24 = vmax.f32 %v31_v8, %v32_v9  ;;  %v156_v34 = vmax.f32 %v49_v12, %v50_v13 }
  0x18   :  { %v67_v17 = vadd.f32 %v34_v15, %v33_v14  ;;  %v35_v20 = vld [vmem:[#allocation2 + $0x30] sm:$0xff]  ;;  %v36_v21 = vld [vmem:[#allocation2 + $0x38] sm:$0xff]  ;;  %v94_v22 = vadd.f32 %v52_v19, %v51_v18  ;;  %v53_v28 = vld [vmem:[#allocation2 + $0xc0] sm:$0xff]  ;;  %v132_v35 = vmax.f32 %v33_v14, %v34_v15  ;;  %v159_v42 = vmax.f32 %v51_v18, %v52_v19 }
  0x19   :  { %v70_v23 = vadd.f32 %v36_v21, %v35_v20  ;;  %v54_v29 = vld [vmem:[#allocation2 + $0xc8] sm:$0xff]  ;;  %v37_v30 = vld [vmem:[#allocation2 + $0x40] sm:$0xff]  ;;  %v55_v36 = vld [vmem:[#allocation2 + $0xd0] sm:$0xff]  ;;  %v135_v43 = vmax.f32 %v35_v20, %v36_v21  ;;  %v877_v13 = vmov 0.0   ;;  %vm252_vm7 = vcmask 523712  }
  0x1a   :  { %89 = vadd.xlane.f32.xlu1 %v88_v10  ;;  %v38_v31 = vld [vmem:[#allocation2 + $0x48] sm:$0xff]  ;;  %v97_v32 = vadd.f32 %v54_v29, %v53_v28  ;;  %v56_v37 = vld [vmem:[#allocation2 + $0xd8] sm:$0xff]  ;;  %v39_v38 = vld [vmem:[#allocation2 + $0x50] sm:$0xff]  ;;  %v162_v50 = vmax.f32 %v53_v28, %v54_v29  ;;  %756 = vmatprep.mubr.msk.f32.mxu0 %vm876_vm0, %v877_v13  ;;  %v199_v28 = vlaneseq  ;;  %vm293_vm8 = vcmask 1041409  }
  0x1b   :  { %65 = vadd.xlane.f32.xlu0 %v64_v11  ;;  %v73_v33 = vadd.f32 %v38_v31, %v37_v30  ;;  %v40_v39 = vld [vmem:[#allocation2 + $0x58] sm:$0xff]  ;;  %v100_v40 = vadd.f32 %v56_v37, %v55_v36  ;;  %v57_v44 = vld [vmem:[#allocation2 + $0xe0] sm:$0xff]  ;;  %v58_v45 = vld [vmem:[#allocation2 + $0xe8] sm:$0xff]  ;;  %v138_v51 = vmax.f32 %v37_v30, %v38_v31  ;;  %v165_v58 = vmax.f32 %v55_v36, %v56_v37 }
  0x1c   :  { %v76_v41 = vadd.f32 %v40_v39, %v39_v38  ;;  %v41_v46 = vld [vmem:[#allocation2 + $0x60] sm:$0xff]  ;;  %v42_v47 = vld [vmem:[#allocation2 + $0x68] sm:$0xff]  ;;  %v103_v48 = vadd.f32 %v58_v45, %v57_v44  ;;  %v59_v52 = vld [vmem:[#allocation2 + $0xf0] sm:$0xff]  ;;  %v141_v59 = vmax.f32 %v39_v38, %v40_v39  ;;  %v168_v62 = vmax.f32 %v57_v44, %v58_v45  ;;  %775 = vmatprep.mubr.msk.f32.mxu1 %vm876_vm0, %v877_v13 }
  0x1d   :  { %v79_v49 = vadd.f32 %v42_v47, %v41_v46  ;;  %v60_v53 = vld [vmem:[#allocation2 + $0xf8] sm:$0xff]  ;;  %v43_v54 = vld [vmem:[#allocation2 + $0x70] sm:$0xff]  ;;  %v174_v60 = vld [vmem:[%s1071_s1] sm:$0xff]  ;;  %v144_v0 = vmax.f32 %v41_v46, %v42_v47  ;;  %v200_v31 = vand.u32 127, %v199_v28  ;;  %vm295_vm9 = vcmask 523264  }
  0x1e   :  { %92 = vadd.xlane.f32.xlu1 %v91_v16  ;;  %v44_v55 = vld [vmem:[#allocation2 + $0x78] sm:$0xff]  ;;  %v106_v56 = vadd.f32 %v60_v53, %v59_v52  ;;  %v175_v61 = vld [vmem:[%s1071_s1 + $0x8] sm:$0xff]  ;;  %v176_v2 = vld [vmem:[%s1071_s1 + $0x10] sm:$0xff]  ;;  %v171_v4 = vmax.f32 %v59_v52, %v60_v53  ;;  %vm541_vm10 = vcmask 1043456   ;;  %vm537_vm11 = vcmask 31744  }
  0x1f   :  { %68 = vadd.xlane.f32.xlu0 %v67_v17  ;;  %v82_v57 = vadd.f32 %v44_v55, %v43_v54  ;;  %v789_v63 = vpack.c.bf16 %v175_v61, %v174_v60  ;;  %v177_v3 = vld [vmem:[%s1071_s1 + $0x18] sm:$0xff]  ;;  %v147_v6 = vmax.f32 %v43_v54, %v44_v55  ;;  %v178_v7 = vld [vmem:[%s1071_s1 + $0x20] sm:$0xff]  ;;  %v179_v8 = vld [vmem:[%s1071_s1 + $0x28] sm:$0xff]  ;;  %v212_v36 = vadd.s32 4294967280, %v200_v31 }
  0x20   :  { %v792_v5 = vpack.c.bf16 %v177_v3, %v176_v2  ;;  %v795_v9 = vpack.c.bf16 %v179_v8, %v178_v7  ;;  %v180_v10 = vld [vmem:[%s1071_s1 + $0x30] sm:$0xff]  ;;  %v181_v11 = vld [vmem:[%s1071_s1 + $0x38] sm:$0xff]  ;;  %v219_v37 = vadd.s32 4294967272, %v200_v31  ;;  %v226_v38 = vadd.s32 4294967264, %v200_v31 }
  0x21   :  { %790 = vmatpush3.bf16.msra.mxu0 %v789_v63  ;;  %802 = vmatpush3.bf16.msra.mxu1 %v789_v63  ;;  %v798_v12 = vpack.c.bf16 %v181_v11, %v180_v10  ;;  %v240_v45 = vadd.s32 4294967248, %v200_v31  ;;  %vm694_vm12 = vcmask 517120  }
  0x22   :  { %95 = vadd.xlane.f32.xlu1 %v94_v22  ;;  %791 = vmatprep.subr.bf16.mxu0 %v875_v1 }
  0x23   :  { %71 = vadd.xlane.f32.xlu0 %v70_v23  ;;  %803 = vmatprep.subr.bf16.mxu1 %v875_v1 }
  0x25   :  { %793 = vmatpush3.bf16.msra.mxu0 %v792_v5  ;;  %805 = vmatpush3.bf16.msra.mxu1 %v792_v5 }
  0x26   :  { %130 = vmax.xlane.f32.xlu1 %v129_v24  ;;  %794 = vmatprep.subr.bf16.mxu0 %v875_v1 }
  0x27   :  { %127 = vmax.xlane.f32.xlu0 %v126_v25  ;;  %806 = vmatprep.subr.bf16.mxu1 %v875_v1 }
  0x29   :  { %796 = vmatpush3.bf16.msra.mxu0 %v795_v9  ;;  %808 = vmatpush3.bf16.msra.mxu1 %v795_v9 }
  0x2a   :  { %154 = vmax.xlane.f32.xlu1 %v153_v26  ;;  %797 = vmatprep.subr.bf16.mxu0 %v875_v1 }
  0x2b   :  { %151 = vmax.xlane.f32.xlu0 %v150_v27  ;;  %809 = vmatprep.subr.bf16.mxu1 %v875_v1 }
  0x2d   :  { %799 = vmatpush3.bf16.msra.mxu0 %v798_v12  ;;  %811 = vmatpush3.bf16.msra.mxu1 %v798_v12 }
  0x2e   :  { %98 = vadd.xlane.f32.xlu1 %v97_v32  ;;  %783 = vmatprep.subr.mxu0 %v877_v13 }
  0x2f   :  { %74 = vadd.xlane.f32.xlu0 %v73_v33  ;;  %778 = vmatprep.subr.mxu1 %v877_v13  ;;  %v202_v33 = vshrl.u32 %v199_v28, 7 }
  0x31   :  { %v961_v44 = vsub.s32 %v212_v36, %v202_v33  ;;  %v963_v47 = vsub.s32 %v219_v37, %v202_v33  ;;  %v969_v60 = vsub.s32 %v240_v45, %v202_v33 }
  0x32   :  { %157 = vmax.xlane.f32.xlu1 %v156_v34 }
  0x33   :  { %133 = vmax.xlane.f32.xlu0 %v132_v35  ;;  %v205_v35 = vadd.s32 4294967288, %v200_v31 }
  0x36   :  { %101 = vadd.xlane.f32.xlu1 %v100_v40  ;;  %v955_v40 = vsub.s32 %v200_v31, %v202_v33 }
  0x37   :  { %77 = vadd.xlane.f32.xlu0 %v76_v41  ;;  %v233_v41 = vadd.s32 4294967256, %v200_v31 }
  0x39   :  { %v967_v55 = vsub.s32 %v233_v41, %v202_v33 }
  0x3a   :  { %160 = vmax.xlane.f32.xlu1 %v159_v42 }
  0x3b   :  { %136 = vmax.xlane.f32.xlu0 %v135_v43  ;;  %v959_v43 = vsub.s32 %v205_v35, %v202_v33 }
  0x3e   :  { %104 = vadd.xlane.f32.xlu1 %v103_v48 }
  0x3f   :  { %80 = vadd.xlane.f32.xlu0 %v79_v49 }
  0x42   :  { %163 = vmax.xlane.f32.xlu1 %v162_v50  ;;  %v965_v50 = vsub.s32 %v226_v38, %v202_v33 }
  0x43   :  { %139 = vmax.xlane.f32.xlu0 %v138_v51 }
  0x46   :  { %107 = vadd.xlane.f32.xlu1 %v106_v56 }
  0x47   :  { %83 = vadd.xlane.f32.xlu0 %v82_v57 }
  0x4a   :  { %166 = vmax.xlane.f32.xlu1 %v165_v58 }
  0x4b   :  { %142 = vmax.xlane.f32.xlu0 %v141_v59 }
  0x4e   :  { %169 = vmax.xlane.f32.xlu1 %v168_v62 }
  0x4f   :  { %145 = vmax.xlane.f32.xlu0 %v144_v0  ;;  %v247_v0 = vadd.s32 4294967240, %v200_v31 }
  0x52   :  { %172 = vmax.xlane.f32.xlu1 %v171_v4 }
  0x53   :  { %148 = vmax.xlane.f32.xlu0 %v147_v6 }
  0xa3   :  { %v87_v14 = vpop.xlane.xlu1 %86 }
  0xa4   :  { %v63_v15 = vpop.xlane.xlu0 %62  ;;  %v118_v52 = vmul.f32 0.00390625, %v87_v14 }
  0xa5   :  { %v110_v57 = vmul.f32 0.00390625, %v63_v15 }
  0xa6   :  { %v257_v6 = vrot.slane %v118_v52, %v955_v40 }
  0xa7   :  { %v90_v16 = vpop.xlane.xlu1 %89  ;;  %v204_v11 = vrot.slane %v110_v57, %v955_v40 }
  0xa8   :  { %v66_v17 = vpop.xlane.xlu0 %65  ;;  %v119_v46 = vmul.f32 0.00390625, %v90_v16 }
  0xa9   :  { %v111_v48 = vmul.f32 0.00390625, %v66_v17 }
  0xaa   :  { %v261_v61 = vrot.slane %v119_v46, %v959_v43 }
  0xab   :  { %v93_v18 = vpop.xlane.xlu1 %92  ;;  %v209_v1 = vrot.slane %v111_v48, %v959_v43 }
  0xac   :  { %v69_v19 = vpop.xlane.xlu0 %68  ;;  %v120_v49 = vmul.f32 0.00390625, %v93_v18  ;;  %v262_v15 = vsel %vm210_vm1, %v261_v61, %v257_v6  ;;  %v987_v18 = vsub.s32 %v247_v0, %v202_v33 }
  0xad   :  { %v112_v53 = vmul.f32 0.00390625, %v69_v19  ;;  %v211_v19 = vsel %vm210_vm1, %v209_v1, %v204_v11 }
  0xae   :  { %v266_v2 = vrot.slane %v120_v49, %v961_v44 }
  0xaf   :  { %v96_v20 = vpop.xlane.xlu1 %95  ;;  %v216_v7 = vrot.slane %v112_v53, %v961_v44 }
  0xb0   :  { %v72_v21 = vpop.xlane.xlu0 %71  ;;  %v121_v54 = vmul.f32 0.00390625, %v96_v20  ;;  %v267_v20 = vsel %vm217_vm2, %v266_v2, %v262_v15 }
  0xb1   :  { %v113_v58 = vmul.f32 0.00390625, %v72_v21  ;;  %v218_v28 = vsel %vm217_vm2, %v216_v7, %v211_v19 }
  0xb2   :  { %v271_v8 = vrot.slane %v121_v54, %v963_v47 }
  0xb3   :  { %v941_v22 = vpop.xlane.xlu1 %130  ;;  %v223_v12 = vrot.slane %v113_v58, %v963_v47 }
  0xb4   :  { %v943_v23 = vpop.xlane.xlu0 %127  ;;  %v272_v31 = vsel %vm224_vm3, %v271_v8, %v267_v20  ;;  %v392_v58 = vrot.slane %v941_v22, %v959_v43 }
  0xb5   :  { %v225_v33 = vsel %vm224_vm3, %v223_v12, %v218_v28 }
  0xb7   :  { %v945_v24 = vpop.xlane.xlu1 %154 }
  0xb8   :  { %v947_v25 = vpop.xlane.xlu0 %151  ;;  %v431_v52 = vrot.slane %v945_v24, %v959_v43 }
  0xb9   :  { %v427_v53 = vrot.slane %v947_v25, %v955_v40 }
  0xbb   :  { %v99_v26 = vpop.xlane.xlu1 %98 }
  0xbc   :  { %v75_v27 = vpop.xlane.xlu0 %74  ;;  %v122_v59 = vmul.f32 0.00390625, %v99_v26 }
  0xbd   :  { %v114_v62 = vmul.f32 0.00390625, %v75_v27 }
  0xbe   :  { %v276_v14 = vrot.slane %v122_v59, %v965_v50  ;;  %v388_v59 = vrot.slane %v943_v23, %v955_v40 }
  0xbf   :  { %v949_v29 = vpop.xlane.xlu1 %157  ;;  %v230_v16 = vrot.slane %v114_v62, %v965_v50 }
  0xc0   :  { %v951_v30 = vpop.xlane.xlu0 %133  ;;  %v277_v36 = vsel %vm231_vm4, %v276_v14, %v272_v31  ;;  %v436_v61 = vrot.slane %v949_v29, %v961_v44  ;;  %v432_v29 = vsel %vm210_vm1, %v431_v52, %v427_v53 }
  0xc1   :  { %v232_v38 = vsel %vm231_vm4, %v230_v16, %v225_v33  ;;  %v397_v24 = vrot.slane %v951_v30, %v961_v44  ;;  %v182_v16 = vld [vmem:[%s1072_s2] sm:$0xf]  ;;  %s878_s2 = smov [#allocation5]  }
  0xc2   :  { %s702_s15 = sshll.u32 %s878_s2, 4  ;;  %s703_s15 = int_to_ptr.vmem [resolvable:$true] %s702_s15 }
  0xc3   :  { %v102_v32 = vpop.xlane.xlu1 %101  ;;  %s846_s16 = scalar_lea.vmem %s703_s15, 32  ;;  %p851_p9 = scmp.lt.s32.totalorder %s703_s15, %s703_s15 }
  0xc4   :  { %v78_v34 = vpop.xlane.xlu0 %77  ;;  %v123_v63 = vmul.f32 0.00390625, %v102_v32  ;;  %p847_p8 = scmp.ne.s32.totalorder %s703_s15, %s846_s16  ;;  %p852_p10 = scmp.lt.s32.totalorder %s846_s16, %s846_s16 }
  0xc5   :  { %v115_v3 = vmul.f32 0.00390625, %v78_v34 }
  0xc6   :  { %v281_v17 = vrot.slane %v123_v63, %v967_v55  ;;  %p853_p11 = por %p852_p10, %p851_p9 }
  0xc7   :  { %v953_v39 = vpop.xlane.xlu1 %160  ;;  %v237_v21 = vrot.slane %v115_v3, %v967_v55 }
  0xc8   :  { %v957_v42 = vpop.xlane.xlu0 %136  ;;  %v282_v41 = vsel %vm238_vm5, %v281_v17, %v277_v36  ;;  %v441_v25 = vrot.slane %v953_v39, %v963_v47  ;;  %v393_v39 = vsel %vm210_vm1, %v392_v58, %v388_v59  ;;  %p854_p12 = pnand %p853_p11, %p847_p8 }
  0xc9   :  { %v239_v46 = vsel %vm238_vm5, %v237_v21, %v232_v38  ;;  %v402_v0 = vrot.slane %v957_v42, %v963_v47  ;;  %v437_v42 = vsel %vm217_vm2, %v436_v61, %v432_v29  ;;  %v398_v1 = vsel %vm217_vm2, %v397_v24, %v393_v39 }
  0xca   :  { %v442_v2 = vsel %vm224_vm3, %v441_v25, %v437_v42 }
  0xcb   :  { %v105_v51 = vpop.xlane.xlu1 %104  ;;  %v403_v3 = vsel %vm224_vm3, %v402_v0, %v398_v1 }
  0xcc   :  { %v81_v56 = vpop.xlane.xlu0 %80  ;;  %v124_v4 = vmul.f32 0.00390625, %v105_v51 }
  0xcd   :  { %v116_v9 = vmul.f32 0.00390625, %v81_v56 }
  0xce   :  { %v286_v26 = vrot.slane %v124_v4, %v969_v60 }
  0xcf   :  { %v974_v5 = vpop.xlane.xlu1 %163  ;;  %v244_v32 = vrot.slane %v116_v9, %v969_v60 }
  0xd0   :  { %v979_v10 = vpop.xlane.xlu0 %139  ;;  %v287_v48 = vsel %vm245_vm6, %v286_v26, %v282_v41  ;;  %v446_v22 = vrot.slane %v974_v5, %v965_v50 }
  0xd1   :  { %v246_v54 = vsel %vm245_vm6, %v244_v32, %v239_v46  ;;  %v407_v40 = vrot.slane %v979_v10, %v965_v50 }
  0xd2   :  { %v447_v4 = vsel %vm231_vm4, %v446_v22, %v442_v2 }
  0xd3   :  { %v108_v27 = vpop.xlane.xlu1 %107  ;;  %v408_v6 = vsel %vm231_vm4, %v407_v40, %v403_v3 }
  0xd4   :  { %v125_v34 = vmul.f32 0.00390625, %v108_v27  ;;  %v84_v35 = vpop.xlane.xlu0 %83 }
  0xd5   :  { %v117_v37 = vmul.f32 0.00390625, %v84_v35 }
  0xd6   :  { %v291_v45 = vrot.slane %v125_v34, %v987_v18 }
  0xd7   :  { %v251_v49 = vrot.slane %v117_v37, %v987_v18  ;;  %v167_v51 = vpop.xlane.xlu1 %166 }
  0xd8   :  { %v143_v56 = vpop.xlane.xlu0 %142  ;;  %v292_v57 = vsel %vm252_vm7, %v291_v45, %v287_v48  ;;  %v451_v30 = vrot.slane %v167_v51, %v967_v55 }
  0xd9   :  { %v253_v62 = vsel %vm252_vm7, %v251_v49, %v246_v54  ;;  %v412_v44 = vrot.slane %v143_v56, %v967_v55 }
  0xda   :  { %v294_v63 = vsel %vm293_vm8, %v292_v57, %v253_v62  ;;  %v452_v7 = vsel %vm238_vm5, %v451_v30, %v447_v4 }
  0xdb   :  { %757 = vmatmul.mubr.msk.f32.vlgmr.msra.gmra.mrb[0].mxu0 %vm295_vm9, %v294_v63  ;;  %v170_v23 = vpop.xlane.xlu1 %169  ;;  %v413_v9 = vsel %vm238_vm5, %v412_v44, %v408_v6 }
  0xdc   :  { %v146_v43 = vpop.xlane.xlu0 %145  ;;  %785 = vmatprep.mubr.msk.f32.mxu0 %vm876_vm0, %v877_v13  ;;  %v456_v47 = vrot.slane %v170_v23, %v969_v60  ;;  %784 = vmatpush3.msk.msra.mxu0 %vm541_vm10, %v182_v16 }
  0xdd   :  { %v417_v50 = vrot.slane %v146_v43, %v969_v60 }
  0xde   :  { %v457_v10 = vsel %vm245_vm6, %v456_v47, %v452_v7 }
  0xdf   :  { %v173_v5 = vpop.xlane.xlu1 %172  ;;  %v418_v60 = vsel %vm245_vm6, %v417_v50, %v413_v9 }
  0xe0   :  { %v461_v8 = vrot.slane %v173_v5, %v987_v18  ;;  %v149_v55 = vpop.xlane.xlu0 %148 }
  0xe1   :  { %v422_v11 = vrot.slane %v149_v55, %v987_v18 }
  0xe2   :  { %v462_v12 = vsel %vm252_vm7, %v461_v8, %v457_v10 }
  0xe3   :  { %v423_v14 = vsel %vm252_vm7, %v422_v11, %v418_v60 }
  0xe4   :  { %v463_v15 = vsel %vm293_vm8, %v462_v12, %v423_v14 }
  0xe5   :  { %776 = vmatmul.mubr.msk.f32.vlgmr.msra.gmra.mrb[0].mxu1 %vm295_vm9, %v463_v15 }
  0xe6   :  { %780 = vmatprep.mubr.msk.f32.mxu1 %vm876_vm0, %v877_v13  ;;  %779 = vmatpush3.msk.msra.mxu1 %vm541_vm10, %v182_v16 }
 0x1ae   :  { %v364_v17 = vpop.f32.mrb[0].mxu0 }
 0x1af   :  { %v368_v18 = vmax.f32 %v364_v17, 0.0  ;;  %v758_v19 = vpop.f32.mrb[1].mxu0 }
 0x1b1   :  { %786 = vmatmul.mubr.msk.f32.vlgmr.msra.gmra.mrb[2].mxu0 %vm537_vm11, %v368_v18 }
 0x1b8   :  { %v532_v20 = vpop.f32.mrb[0].mxu1 }
 0x1b9   :  { %v536_v21 = vmax.f32 %v532_v20, 0.0  ;;  %v777_v26 = vpop.f32.mrb[1].mxu1 }
 0x1bb   :  { %781 = vmatmul.mubr.msk.f32.vlgmr.msra.gmra.mrb[2].mxu1 %vm537_vm11, %v536_v21 }
 0x284   :  { %v684_v27 = vpop.f32.mrb[2].mxu0 }
 0x285   :  { %v787_v28 = vpop.f32.mrb[3].mxu0 }
 0x28e   :  { %v611_v31 = vpop.f32.mrb[2].mxu1 }
 0x28f   :  { %v685_v13 = vadd.f32 %v684_v27, %v611_v31  ;;  %v782_v32 = vpop.f32.mrb[3].mxu1 }
 0x291   :  { %v717_v34 = vmul.f32 -1.442695, %v685_v13 }
 0x293   :  { %820 = vpow2.f32 %v717_v34 }
 0x29d   :  { %v821_v35 = vpop.eup %820 }
 0x29e   :  { %v691_v33 = vadd.f32 1.0, %v821_v35 }
 0x2a0   :  { %822 = vrcp.f32 %v691_v33 }
 0x2aa   :  { %v823_v36 = vpop.eup %822 }
 0x2ab   :  { %695 = vst.msk [vmem:[#allocation5] sm:$0x3] %vm694_vm12, %v823_v36 }
 0x2ac   :  { %857 = shalt.err (!%p854_p12)
}
 0x2ad   :  { %s858_s19 = scalar_lea.hbm %s1073_s3, 32 }
 0x2ae   :  { %p859_p13 = scmp.ne.s32.totalorder %s1073_s3, %s858_s19  ;;  %p862_p0 = scmp.lt.u32.totalorder %s858_s19, %s1073_s3 }
 0x2b0   :  { %p864_p1 = pnand %p862_p0, %p859_p13 }
 0x2b2   :  { %867 = shalt.err (!%p864_p1)
}
 0x2b3   :  { %705 = dma.vmem_to_hbm [thread:$0]  %s703_s15, 32, %s1073_s3, [#allocation4]  }
 0x2b4   :  { %870 = dma.done.wait [#allocation4], 32  }
 0x2b5   :  { %871 = vsyncadd [#allocation4], 4294967264 }
 0x2b6   :  { %709 = vsyncpa [#allocation3], 1 }
 0x2b7   :  { %710 = vsyncpa [#allocation4], 1 }

</bundles_post_ra>
